<compile_context>
chip_gen: v5e
topology: v5e:2x2
jax: 0.10.0
libtpu: 0.0.40
codegen_flags: <defaults>
</compile_context>

<pallas_src>
import functools

import numpy as np
import jax
import jax.numpy as jnp
from jax import lax
from jax.experimental import pallas as pl
from jax.experimental.pallas import tpu as pltpu


def _round_up(x, m):
    return ((x + m - 1) // m) * m


def _sinkhorn_kernel(x_ref, y_ref, pi_ref, c_ref, u_ref, v_ref, *,
                     eps, max_iter, thresh, p, p1, p2):
    x = x_ref[...]                       # (bn, p1p, d)
    y = y_ref[...]                       # (bn, p2p, d)
    bn, p1p, d = x_ref.shape
    _, p2p, _ = y_ref.shape

    f32 = jnp.float32
    eps_f = f32(eps)
    inv_eps = f32(1.0 / eps)
    log_mu = f32(np.log(1.0 / p1))       # real (unpadded) point counts
    log_nu = f32(np.log(1.0 / p2))
    thresh_f = f32(thresh)
    neg_big = f32(-1e30)

    # ---- cost matrix ----
    if p == 2:
        # MXU path: |x-y|^2 = |x|^2 + |y|^2 - 2 x.y
        xy = jnp.einsum('bid,bjd->bij', x, y,
                        preferred_element_type=jnp.float32)       # (bn,p1p,p2p)
        x_sq = jnp.sum(x * x, axis=-1, keepdims=True)             # (bn,p1p,1)
        y_sq = jnp.sum(y * y, axis=-1)[:, None, :]                # (bn,1,p2p)
        c = x_sq + y_sq - 2.0 * xy
    else:
        # generic fallback (rarely used): elementwise |x-y|^p
        c = jnp.zeros((bn, p1p, p2p), jnp.float32)
        for dd in range(d):
            diff = jnp.abs(x[:, :, dd][:, :, None] - y[:, :, dd][:, None, :])
            c = c + diff ** p

    c_ref[...] = c

    # ---- precompute -C/eps once; mask padded rows/cols out of the LSEs ----
    pad_rows = p1p != p1
    pad_cols = p2p != p2
    neg_c_scaled = c * (-inv_eps)
    if pad_rows or pad_cols:
        row_ids = lax.broadcasted_iota(jnp.int32, (p1p, p2p), 0)
        col_ids = lax.broadcasted_iota(jnp.int32, (p1p, p2p), 1)
        valid = jnp.logical_and(row_ids < p1, col_ids < p2)[None]
        neg_c_scaled = jnp.where(valid, neg_c_scaled, neg_big)
    if pad_rows:
        u_mask = (lax.broadcasted_iota(jnp.int32, (p1p, 1), 0) < p1)[None]
    if pad_cols:
        v_mask = (lax.broadcasted_iota(jnp.int32, (1, p2p), 1) < p2)[None]

    def make_m(u3, v3):
        # M_{ij} = (-C_{ij} + u_i + v_j) / eps ; scale u/v on the small arrays.
        return neg_c_scaled + u3 * inv_eps + v3 * inv_eps

    num_u = (max_iter + 1) // 2          # even PyTorch iterations (u updates)
    num_v = max_iter // 2                # odd PyTorch iterations (v updates)

    u0 = jnp.zeros((bn, p1p, 1), jnp.float32)
    v0 = jnp.zeros((bn, 1, p2p), jnp.float32)

    def cond_fn(carry):
        k, _, _, err = carry
        return jnp.logical_and(k < num_u, err >= thresh_f)

    def body_fn(carry):
        k, u3, v3, _ = carry

        # --- u half-step: logsumexp over columns (last axis) ---
        m = make_m(u3, v3)
        mx = jnp.max(m, axis=-1, keepdims=True)
        lse = mx + jnp.log(jnp.sum(jnp.exp(m - mx), axis=-1, keepdims=True))
        u_new = eps_f * (log_mu - lse) + u3
        if pad_rows:
            u_new = jnp.where(u_mask, u_new, 0.0)
        err_new = jnp.sum(jnp.abs(u_new - u3)) * f32(1.0 / bn)

        # --- v half-step: logsumexp over rows; only applied while unconverged
        #     and while the PyTorch iteration count allows it ---
        do_v = jnp.logical_and(err_new >= thresh_f, k < num_v)
        m2 = make_m(u_new, v3)
        mx2 = jnp.max(m2, axis=-2, keepdims=True)
        lse2 = mx2 + jnp.log(jnp.sum(jnp.exp(m2 - mx2), axis=-2, keepdims=True))
        v_cand = eps_f * (log_nu - lse2) + v3
        if pad_cols:
            v_cand = jnp.where(v_mask, v_cand, 0.0)
        v_new = jnp.where(do_v, v_cand, v3)

        return k + 1, u_new, v_new, err_new

    _, u3, v3, _ = lax.while_loop(
        cond_fn, body_fn, (jnp.int32(0), u0, v0, f32(jnp.inf)))

    pi_ref[...] = jnp.exp(make_m(u3, v3))
    u_ref[...] = u3
    v_ref[...] = v3


def sinkhorn_distance(x, y, *, eps, max_iter, thresh=0.01, p=2,
                      batch_block=None):
    """Pallas equivalent of SinkhornDistance(eps, max_iter).forward(x, y).

    Returns (pi, C, U, V).  `reduction` is unused by the torch forward.
    `batch_block`: optional batch tile size (must divide N).  When set, the
    batch is processed on a ("parallel",) grid (good for v7x megacore / VMEM),
    but the early-stop err then becomes per-block instead of whole-batch.
    """
    x = jnp.asarray(x, jnp.float32)
    y = jnp.asarray(y, jnp.float32)
    n, p1, d = x.shape
    n2, p2, d2 = y.shape
    assert n == n2 and d == d2

    # Lane/sublane-dense padding: P1 -> multiple of 8, P2 -> multiple of 128.
    p1p = _round_up(p1, 8)
    p2p = _round_up(p2, 128)
    if p1p != p1:
        x = jnp.pad(x, ((0, 0), (0, p1p - p1), (0, 0)))
    if p2p != p2:
        y = jnp.pad(y, ((0, 0), (0, p2p - p2), (0, 0)))

    if batch_block is None:
        bn = n
    else:
        bn = int(batch_block)
        assert n % bn == 0, "batch_block must divide the batch size"
    grid = (n // bn,)

    kernel = functools.partial(_sinkhorn_kernel, eps=float(eps),
                               max_iter=int(max_iter), thresh=float(thresh),
                               p=int(p), p1=p1, p2=p2)

    out_shape = (
        jax.ShapeDtypeStruct((n, p1p, p2p), jnp.float32),   # pi (padded)
        jax.ShapeDtypeStruct((n, p1p, p2p), jnp.float32),   # C  (padded)
        jax.ShapeDtypeStruct((n, p1p, 1), jnp.float32),     # U  (padded, 3-D)
        jax.ShapeDtypeStruct((n, 1, p2p), jnp.float32),     # V  (padded, 3-D)
    )
    in_specs = [
        pl.BlockSpec((bn, p1p, d), lambda b: (b, 0, 0)),
        pl.BlockSpec((bn, p2p, d), lambda b: (b, 0, 0)),
    ]
    out_specs = (
        pl.BlockSpec((bn, p1p, p2p), lambda b: (b, 0, 0)),
        pl.BlockSpec((bn, p1p, p2p), lambda b: (b, 0, 0)),
        pl.BlockSpec((bn, p1p, 1), lambda b: (b, 0, 0)),
        pl.BlockSpec((bn, 1, p2p), lambda b: (b, 0, 0)),
    )

    # Explicit VMEM budget: double-buffered blocks + ~5 full-size temporaries
    # (c, -c/eps, m, exp/max temps).  For v7x (64 MiB) pick batch_block so this
    # stays well under the physical capacity.
    block_bytes = 4 * (bn * p1p * d + bn * p2p * d
                       + 2 * bn * p1p * p2p + bn * p1p + bn * p2p)
    est = 2 * block_bytes + 4 * 5 * bn * p1p * p2p
    vmem_limit = int(min(max(2 * est, 16 * 1024 * 1024), 100 * 1024 * 1024))

    pi_p, c_p, u_p, v_p = pl.pallas_call(
        kernel,
        out_shape=out_shape,
        grid=grid,
        in_specs=in_specs,
        out_specs=out_specs,
        compiler_params=pltpu.CompilerParams(
            dimension_semantics=("parallel",),
            vmem_limit_bytes=vmem_limit),
    )(x, y)

    pi = pi_p[:, :p1, :p2]
    C = c_p[:, :p1, :p2]
    U = u_p[:, :p1, 0]
    V = v_p[:, 0, :p2]
    return pi, C, U, V


def _reference(x, y, eps, max_iter, thresh=0.01):
    """Direct transcription of the PyTorch forward in plain JAX (for checking)."""
    x = jnp.asarray(x, jnp.float32)
    y = jnp.asarray(y, jnp.float32)
    C = jnp.sum(jnp.abs(x[:, :, None, :] - y[:, None, :, :]) ** 2, axis=-1)
    n, p1, p2 = C.shape
    log_mu = jnp.log(jnp.float32(1.0 / p1))
    log_nu = jnp.log(jnp.float32(1.0 / p2))

    def M(u, v):
        return (-C + u[:, :, None] + v[:, None, :]) / eps

    def lse_last(m):
        mx = jnp.max(m, axis=-1, keepdims=True)
        return (mx + jnp.log(jnp.sum(jnp.exp(m - mx), axis=-1,
                                     keepdims=True)))[..., 0]

    u = jnp.zeros((n, p1), jnp.float32)
    v = jnp.zeros((n, p2), jnp.float32)
    err = float("inf")
    for i in range(max_iter):
        if i % 2 == 0:
            u1 = u
            u = eps * (log_mu - lse_last(M(u, v))) + u
            err = float(jnp.mean(jnp.sum(jnp.abs(u - u1), axis=-1)))
        else:
            v = eps * (log_nu - lse_last(jnp.swapaxes(M(u, v), -2, -1))) + v
        if err < thresh:
            break
    pi = jnp.exp(M(u, v))
    return pi, C, u, v


if __name__ == "__main__":
    key = jax.random.PRNGKey(0)
    kx, ky = jax.random.split(key)
    N, P1, P2, D = 2, 16, 8, 4
    eps, max_iter = 0.1, 50

    x = jax.random.uniform(kx, (N, P1, D), dtype=jnp.float32)
    y = jax.random.uniform(ky, (N, P2, D), dtype=jnp.float32)

    # --- whole-batch kernel (exact reference early-stop semantics) ---
    pi, C, U, V = jax.block_until_ready(
        sinkhorn_distance(x, y, eps=eps, max_iter=max_iter))
    pi_r, C_r, U_r, V_r = _reference(x, y, eps, max_iter)
    np.testing.assert_allclose(np.asarray(C), np.asarray(C_r), rtol=1e-4, atol=1e-5)
    np.testing.assert_allclose(np.asarray(U), np.asarray(U_r), rtol=1e-3, atol=1e-4)
    np.testing.assert_allclose(np.asarray(V), np.asarray(V_r), rtol=1e-3, atol=1e-4)
    np.testing.assert_allclose(np.asarray(pi), np.asarray(pi_r), rtol=1e-3, atol=1e-5)

    # --- batch-tiled kernel (one batch element per "parallel" grid step) ---
    pi_b, C_b, U_b, V_b = jax.block_until_ready(
        sinkhorn_distance(x, y, eps=eps, max_iter=max_iter, batch_block=1))
    refs = [_reference(x[i:i + 1], y[i:i + 1], eps, max_iter) for i in range(N)]
    pi_s = jnp.concatenate([r[0] for r in refs], axis=0)
    C_s = jnp.concatenate([r[1] for r in refs], axis=0)
    U_s = jnp.concatenate([r[2] for r in refs], axis=0)
    V_s = jnp.concatenate([r[3] for r in refs], axis=0)
    np.testing.assert_allclose(np.asarray(C_b), np.asarray(C_s), rtol=1e-4, atol=1e-5)
    np.testing.assert_allclose(np.asarray(U_b), np.asarray(U_s), rtol=1e-3, atol=1e-4)
    np.testing.assert_allclose(np.asarray(V_b), np.asarray(V_s), rtol=1e-3, atol=1e-4)
    np.testing.assert_allclose(np.asarray(pi_b), np.asarray(pi_s), rtol=1e-3, atol=1e-5)

    print("KERNEL_OK")
</pallas_src>

<mosaic_0001>
module attributes {stable_mosaic.version = 11 : i64} {
  func.func @_sinkhorn_kernel(%arg0: i32, %arg1: memref<2x16x4xf32, #tpu.memory_space<vmem>>, %arg2: memref<2x128x4xf32, #tpu.memory_space<vmem>>, %arg3: memref<2x16x128xf32, #tpu.memory_space<vmem>>, %arg4: memref<2x16x128xf32, #tpu.memory_space<vmem>>, %arg5: memref<2x16x1xf32, #tpu.memory_space<vmem>>, %arg6: memref<2x1x128xf32, #tpu.memory_space<vmem>>) attributes {dimension_semantics = [#tpu.dimension_semantics<parallel>], iteration_bounds = array<i64: 1>, scalar_prefetch = 0 : i64, scratch_operands = 0 : i64, tpu.core_type = #tpu.core_type<tc>, window_params = [{transform_indices = @transform_0, window_bounds = array<i64: 2, 16, 4>}, {transform_indices = @transform_1, window_bounds = array<i64: 2, 128, 4>}, {transform_indices = @transform_2, window_bounds = array<i64: 2, 16, 128>}, {transform_indices = @transform_3, window_bounds = array<i64: 2, 16, 128>}, {transform_indices = @transform_4, window_bounds = array<i64: 2, 16, 1>}, {transform_indices = @transform_5, window_bounds = array<i64: 2, 1, 128>}]} {
    %c0 = arith.constant 0 : index
    %c0_0 = arith.constant 0 : index
    %c0_1 = arith.constant 0 : index
    %0 = vector.load %arg1[%c0, %c0_0, %c0_1] : memref<2x16x4xf32, #tpu.memory_space<vmem>>, vector<2x16x4xf32>
    %c0_2 = arith.constant 0 : index
    %c0_3 = arith.constant 0 : index
    %c0_4 = arith.constant 0 : index
    %1 = vector.load %arg2[%c0_2, %c0_3, %c0_4] : memref<2x128x4xf32, #tpu.memory_space<vmem>>, vector<2x128x4xf32>
    "tpu.trace_start"() <{level = 10 : i32, message = "bid,bjd->bij"}> : () -> ()
    %cst = arith.constant dense<0.000000e+00> : vector<2x16x128xf32>
    %2 = tpu.matmul %0, %1, %cst {dimension_numbers = #tpu.dot_dimension_numbers<[2], [2], [1], [1], [0, 0, 0, 1, 1, 1], [0], [0]>} : vector<2x16x4xf32>, vector<2x128x4xf32>, vector<2x16x128xf32> -> vector<2x16x128xf32>
    "tpu.trace_stop"() : () -> ()
    %3 = arith.mulf %0, %0 : vector<2x16x4xf32>
    %cst_5 = arith.constant dense<0.000000e+00> : vector<2x16xf32>
    %4 = vector.multi_reduction <add>, %3, %cst_5 [2] : vector<2x16x4xf32> to vector<2x16xf32>
    %5 = vector.shape_cast %4 : vector<2x16xf32> to vector<2x16x1xf32>
    %6 = arith.mulf %1, %1 : vector<2x128x4xf32>
    %cst_6 = arith.constant dense<0.000000e+00> : vector<2x128xf32>
    %7 = vector.multi_reduction <add>, %6, %cst_6 [2] : vector<2x128x4xf32> to vector<2x128xf32>
    %8 = vector.shape_cast %7 : vector<2x128xf32> to vector<2x1x128xf32>
    %9 = vector.broadcast %5 : vector<2x16x1xf32> to vector<2x16x128xf32>
    %10 = vector.broadcast %8 : vector<2x1x128xf32> to vector<2x16x128xf32>
    %11 = arith.addf %9, %10 : vector<2x16x128xf32>
    %cst_7 = arith.constant 2.000000e+00 : f32
    %12 = vector.broadcast %cst_7 : f32 to vector<2x16x128xf32>
    %13 = arith.mulf %12, %2 : vector<2x16x128xf32>
    %14 = arith.subf %11, %13 : vector<2x16x128xf32>
    %c0_8 = arith.constant 0 : index
    %c0_9 = arith.constant 0 : index
    %c0_10 = arith.constant 0 : index
    %15 = vector.load %arg4[%c0_8, %c0_9, %c0_10] : memref<2x16x128xf32, #tpu.memory_space<vmem>>, vector<2x16x128xf32>
    tpu.vector_store %arg4[%c0_8, %c0_9, %c0_10], %14 {strides = array<i32>} : memref<2x16x128xf32, #tpu.memory_space<vmem>>, vector<2x16x128xf32>,
    %cst_11 = arith.constant 0.000000e+00 : f32
    %cst_12 = arith.constant 1.000000e+01 : f32
    %16 = arith.subf %cst_11, %cst_12 : f32
    %17 = vector.broadcast %16 : f32 to vector<2x16x128xf32>
    %18 = arith.mulf %14, %17 : vector<2x16x128xf32>
    %19 = tpu.iota {dimensions = array<i32: 0>} : vector<16x128xi32>
    %20 = tpu.iota {dimensions = array<i32: 1>} : vector<16x128xi32>
    %c16_i32 = arith.constant 16 : i32
    %21 = vector.broadcast %c16_i32 : i32 to vector<16x128xi32>
    %22 = arith.cmpi slt, %19, %21 : vector<16x128xi32>
    %c8_i32 = arith.constant 8 : i32
    %23 = vector.broadcast %c8_i32 : i32 to vector<16x128xi32>
    %24 = arith.cmpi slt, %20, %23 : vector<16x128xi32>
    %25 = arith.andi %22, %24 : vector<16x128xi1>
    %26 = vector.shape_cast %25 : vector<16x128xi1> to vector<1x16x128xi1>
    %cst_13 = arith.constant -1.000000e+30 : f32
    %27 = vector.shape_cast %26 : vector<1x16x128xi1> to vector<1x16x128xi1>
    %28 = vector.broadcast %27 : vector<1x16x128xi1> to vector<2x16x128xi1>
    %29 = vector.broadcast %cst_13 : f32 to vector<2x16x128xf32>
    %30 = arith.select %28, %18, %29 : vector<2x16x128xi1>, vector<2x16x128xf32>
    %31 = tpu.iota {dimensions = array<i32: 1>} : vector<1x128xi32>
    %c8_i32_14 = arith.constant 8 : i32
    %32 = vector.broadcast %c8_i32_14 : i32 to vector<1x128xi32>
    %33 = arith.cmpi slt, %31, %32 : vector<1x128xi32>
    %34 = vector.shape_cast %33 : vector<1x128xi1> to vector<1x1x128xi1>
    %cst_15 = arith.constant 0.000000e+00 : f32
    %35 = vector.broadcast %cst_15 : f32 to vector<2x16x1xf32>
    %cst_16 = arith.constant 0.000000e+00 : f32
    %36 = vector.broadcast %cst_16 : f32 to vector<2x1x128xf32>
    %cst_17 = arith.constant 0.00999999977 : f32
    %cst_18 = arith.constant 1.000000e+01 : f32
    %cst_19 = arith.constant -2.77258873 : f32
    %cst_20 = arith.constant 1.000000e-01 : f32
    %cst_21 = arith.constant 0.00999999977 : f32
    %cst_22 = arith.constant -2.07944155 : f32
    %c0_i32 = arith.constant 0 : i32
    %cst_23 = arith.constant 0x7F800000 : f32
    %37:4 = scf.while (%arg7 = %c0_i32, %arg8 = %35, %arg9 = %36, %arg10 = %cst_23) : (i32, vector<2x16x1xf32>, vector<2x1x128xf32>, f32) -> (i32, vector<2x16x1xf32>, vector<2x1x128xf32>, f32) {
      %c25_i32 = arith.constant 25 : i32
      %50 = arith.cmpi slt, %arg7, %c25_i32 : i32
      %51 = arith.cmpf oge, %arg10, %cst_17 : f32
      %52 = arith.andi %50, %51 : i1
      scf.condition(%52) %arg7, %arg8, %arg9, %arg10 : i32, vector<2x16x1xf32>, vector<2x1x128xf32>, f32
    } do {
    ^bb0(%arg7: i32, %arg8: vector<2x16x1xf32>, %arg9: vector<2x1x128xf32>, %arg10: f32):
      %50 = vector.broadcast %cst_18 : f32 to vector<2x16x1xf32>
      %51 = arith.mulf %arg8, %50 : vector<2x16x1xf32>
      %52 = vector.broadcast %51 : vector<2x16x1xf32> to vector<2x16x128xf32>
      %53 = arith.addf %30, %52 : vector<2x16x128xf32>
      %54 = vector.broadcast %cst_18 : f32 to vector<2x1x128xf32>
      %55 = arith.mulf %arg9, %54 : vector<2x1x128xf32>
      %56 = vector.broadcast %55 : vector<2x1x128xf32> to vector<2x16x128xf32>
      %57 = arith.addf %53, %56 : vector<2x16x128xf32>
      %cst_35 = arith.constant dense<0xFF800000> : vector<2x16xf32>
      %58 = vector.multi_reduction <maximumf>, %57, %cst_35 [2] : vector<2x16x128xf32> to vector<2x16xf32>
      %59 = vector.shape_cast %58 : vector<2x16xf32> to vector<2x16x1xf32>
      %60 = vector.broadcast %59 : vector<2x16x1xf32> to vector<2x16x128xf32>
      %61 = arith.subf %57, %60 : vector<2x16x128xf32>
      %62 = math.exp %61 : vector<2x16x128xf32>
      %cst_36 = arith.constant dense<0.000000e+00> : vector<2x16xf32>
      %63 = vector.multi_reduction <add>, %62, %cst_36 [2] : vector<2x16x128xf32> to vector<2x16xf32>
      %64 = vector.shape_cast %63 : vector<2x16xf32> to vector<2x16x1xf32>
      %65 = math.log %64 : vector<2x16x1xf32>
      %66 = arith.addf %59, %65 : vector<2x16x1xf32>
      %67 = vector.broadcast %cst_19 : f32 to vector<2x16x1xf32>
      %68 = arith.subf %67, %66 : vector<2x16x1xf32>
      %69 = vector.broadcast %cst_20 : f32 to vector<2x16x1xf32>
      %70 = arith.mulf %69, %68 : vector<2x16x1xf32>
      %71 = arith.addf %70, %arg8 : vector<2x16x1xf32>
      %72 = arith.subf %71, %arg8 : vector<2x16x1xf32>
      %73 = math.absf %72 : vector<2x16x1xf32>
      %74 = vector.shape_cast %73 : vector<2x16x1xf32> to vector<1x2x16x1xf32>
      %cst_37 = arith.constant dense<0.000000e+00> : vector<1xf32>
      %75 = vector.multi_reduction <add>, %74, %cst_37 [1, 2, 3] : vector<1x2x16x1xf32> to vector<1xf32>
      %76 = vector.shape_cast %75 : vector<1xf32> to vector<1x1x1x1xf32>
      %77 = vector.extract %76[0, 0, 0, 0] : f32 from vector<1x1x1x1xf32>
      %cst_38 = arith.constant 5.000000e-01 : f32
      %78 = arith.mulf %77, %cst_38 : f32
      %79 = arith.cmpf oge, %78, %cst_21 : f32
      %c25_i32 = arith.constant 25 : i32
      %80 = arith.cmpi slt, %arg7, %c25_i32 : i32
      %81 = arith.andi %79, %80 : i1
      %82 = vector.broadcast %cst_18 : f32 to vector<2x16x1xf32>
      %83 = arith.mulf %71, %82 : vector<2x16x1xf32>
      %84 = vector.broadcast %83 : vector<2x16x1xf32> to vector<2x16x128xf32>
      %85 = arith.addf %30, %84 : vector<2x16x128xf32>
      %86 = vector.broadcast %cst_18 : f32 to vector<2x1x128xf32>
      %87 = arith.mulf %arg9, %86 : vector<2x1x128xf32>
      %88 = vector.broadcast %87 : vector<2x1x128xf32> to vector<2x16x128xf32>
      %89 = arith.addf %85, %88 : vector<2x16x128xf32>
      %cst_39 = arith.constant dense<0xFF800000> : vector<2x128xf32>
      %90 = vector.multi_reduction <maximumf>, %89, %cst_39 [1] : vector<2x16x128xf32> to vector<2x128xf32>
      %91 = vector.shape_cast %90 : vector<2x128xf32> to vector<2x1x128xf32>
      %92 = vector.broadcast %91 : vector<2x1x128xf32> to vector<2x16x128xf32>
      %93 = arith.subf %89, %92 : vector<2x16x128xf32>
      %94 = math.exp %93 : vector<2x16x128xf32>
      %cst_40 = arith.constant dense<0.000000e+00> : vector<2x128xf32>
      %95 = vector.multi_reduction <add>, %94, %cst_40 [1] : vector<2x16x128xf32> to vector<2x128xf32>
      %96 = vector.shape_cast %95 : vector<2x128xf32> to vector<2x1x128xf32>
      %97 = math.log %96 : vector<2x1x128xf32>
      %98 = arith.addf %91, %97 : vector<2x1x128xf32>
      %99 = vector.broadcast %cst_22 : f32 to vector<2x1x128xf32>
      %100 = arith.subf %99, %98 : vector<2x1x128xf32>
      %101 = vector.broadcast %cst_20 : f32 to vector<2x1x128xf32>
      %102 = arith.mulf %101, %100 : vector<2x1x128xf32>
      %103 = arith.addf %102, %arg9 : vector<2x1x128xf32>
      %cst_41 = arith.constant 0.000000e+00 : f32
      %104 = vector.shape_cast %34 : vector<1x1x128xi1> to vector<1x1x128xi1>
      %105 = vector.broadcast %104 : vector<1x1x128xi1> to vector<2x1x128xi1>
      %106 = vector.broadcast %cst_41 : f32 to vector<2x1x128xf32>
      %107 = arith.select %105, %103, %106 : vector<2x1x128xi1>, vector<2x1x128xf32>
      %108 = arith.select %81, %107, %arg9 : vector<2x1x128xf32>
      %c1_i32 = arith.constant 1 : i32
      %109 = arith.addi %arg7, %c1_i32 : i32
      scf.yield %109, %71, %108, %78 : i32, vector<2x16x1xf32>, vector<2x1x128xf32>, f32
    }
    %cst_24 = arith.constant 1.000000e+01 : f32
    %38 = vector.broadcast %cst_24 : f32 to vector<2x16x1xf32>
    %39 = arith.mulf %37#1, %38 : vector<2x16x1xf32>
    %40 = vector.broadcast %39 : vector<2x16x1xf32> to vector<2x16x128xf32>
    %41 = arith.addf %30, %40 : vector<2x16x128xf32>
    %cst_25 = arith.constant 1.000000e+01 : f32
    %42 = vector.broadcast %cst_25 : f32 to vector<2x1x128xf32>
    %43 = arith.mulf %37#2, %42 : vector<2x1x128xf32>
    %44 = vector.broadcast %43 : vector<2x1x128xf32> to vector<2x16x128xf32>
    %45 = arith.addf %41, %44 : vector<2x16x128xf32>
    %46 = math.exp %45 : vector<2x16x128xf32>
    %c0_26 = arith.constant 0 : index
    %c0_27 = arith.constant 0 : index
    %c0_28 = arith.constant 0 : index
    %47 = vector.load %arg3[%c0_26, %c0_27, %c0_28] : memref<2x16x128xf32, #tpu.memory_space<vmem>>, vector<2x16x128xf32>
    tpu.vector_store %arg3[%c0_26, %c0_27, %c0_28], %46 {strides = array<i32>} : memref<2x16x128xf32, #tpu.memory_space<vmem>>, vector<2x16x128xf32>,
    %c0_29 = arith.constant 0 : index
    %c0_30 = arith.constant 0 : index
    %c0_31 = arith.constant 0 : index
    %48 = vector.load %arg5[%c0_29, %c0_30, %c0_31] : memref<2x16x1xf32, #tpu.memory_space<vmem>>, vector<2x16x1xf32>
    tpu.vector_store %arg5[%c0_29, %c0_30, %c0_31], %37#1 {strides = array<i32>} : memref<2x16x1xf32, #tpu.memory_space<vmem>>, vector<2x16x1xf32>,
    %c0_32 = arith.constant 0 : index
    %c0_33 = arith.constant 0 : index
    %c0_34 = arith.constant 0 : index
    %49 = vector.load %arg6[%c0_32, %c0_33, %c0_34] : memref<2x1x128xf32, #tpu.memory_space<vmem>>, vector<2x1x128xf32>
    tpu.vector_store %arg6[%c0_32, %c0_33, %c0_34], %37#2 {strides = array<i32>} : memref<2x1x128xf32, #tpu.memory_space<vmem>>, vector<2x1x128xf32>,
    return
  }
  func.func @transform_0(%arg0: i32) -> (i32, i32, i32) {
    %c0_i32 = arith.constant 0 : i32
    %c0_i32_0 = arith.constant 0 : i32
    %c0_i32_1 = arith.constant 0 : i32
    return %arg0, %c0_i32, %c0_i32_0 : i32, i32, i32
  }
  func.func @transform_1(%arg0: i32) -> (i32, i32, i32) {
    %c0_i32 = arith.constant 0 : i32
    %c0_i32_0 = arith.constant 0 : i32
    %c0_i32_1 = arith.constant 0 : i32
    return %arg0, %c0_i32, %c0_i32_0 : i32, i32, i32
  }
  func.func @transform_2(%arg0: i32) -> (i32, i32, i32) {
    %c0_i32 = arith.constant 0 : i32
    %c0_i32_0 = arith.constant 0 : i32
    %c0_i32_1 = arith.constant 0 : i32
    return %arg0, %c0_i32, %c0_i32_0 : i32, i32, i32
  }
  func.func @transform_3(%arg0: i32) -> (i32, i32, i32) {
    %c0_i32 = arith.constant 0 : i32
    %c0_i32_0 = arith.constant 0 : i32
    %c0_i32_1 = arith.constant 0 : i32
    return %arg0, %c0_i32, %c0_i32_0 : i32, i32, i32
  }
  func.func @transform_4(%arg0: i32) -> (i32, i32, i32) {
    %c0_i32 = arith.constant 0 : i32
    %c0_i32_0 = arith.constant 0 : i32
    %c0_i32_1 = arith.constant 0 : i32
    return %arg0, %c0_i32, %c0_i32_0 : i32, i32, i32
  }
  func.func @transform_5(%arg0: i32) -> (i32, i32, i32) {
    %c0_i32 = arith.constant 0 : i32
    %c0_i32_0 = arith.constant 0 : i32
    %c0_i32_1 = arith.constant 0 : i32
    return %arg0, %c0_i32, %c0_i32_0 : i32, i32, i32
  }
}

</mosaic_0001>

<bundles_post_ra>
// kernel: tpu_custom_call.1
= control target key start
LH: loop header
LB: loop body
LE: loop exit
PB: predicated region body
PF: predicated region fallthrough
CT: control target
= control target key end

     0   :  { %11 = vsyncpa [#allocation3], 0  ;;  %vm53_vm0 = vcmask 31744   ;;  %s1804_s0 = inlined_call_operand.vmem [shape: f32[2,16,4], index: 0, kind: input, shape index: {}]   ;;  %s1805_s1 = inlined_call_operand.vmem [shape: f32[2,128,4], index: 1, kind: input, shape index: {}]   ;;  %s1806_s2 = inlined_call_operand.hbm [shape: f32[2,16,128], index: 2, kind: output, shape index: {0}]   ;;  %s1807_s3 = inlined_call_operand.hbm [shape: f32[2,16,128], index: 3, kind: output, shape index: {1}]   ;;  %s1808_s4 = inlined_call_operand.vmem [shape: f32[2,16,1], index: 4, kind: output, shape index: {2}]   ;;  %s1809_s5 = inlined_call_operand.hbm [shape: f32[2,1,128], index: 5, kind: output, shape index: {3}]  }
   0x1   :  { %v1177_v0 = vld [vmem:[%s1805_s1] sm:$0xff]  ;;  %v1182_v1 = vld [vmem:[%s1804_s0 + $0x10] sm:$0xff]  ;;  %v1198_v6 = vld [vmem:[%s1805_s1 + $0x8] sm:$0xff] }
   0x2   :  { %v1187_v2 = vld [vmem:[%s1804_s0] sm:$0xff]  ;;  %v224_v3 = vmul.f32 %v1177_v0, %v1177_v0  ;;  %v210_v4 = vmul.f32 %v1182_v1, %v1182_v1  ;;  %v1203_v7 = vld [vmem:[%s1804_s0 + $0x18] sm:$0xff]  ;;  %v1221_v13 = vld [vmem:[%s1804_s0 + $0x8] sm:$0xff] }
   0x3   :  { %v208_v5 = vmul.f32 %v1187_v2, %v1187_v2  ;;  %v1208_v8 = vld [vmem:[%s1805_s1 + $0x78] sm:$0xff]  ;;  %v1230_v14 = vld [vmem:[%s1805_s1 + $0x70] sm:$0xff] }
   0x4   :  { %v1213_v9 = vld [vmem:[%s1805_s1 + $0xf8] sm:$0xff]  ;;  %v256_v10 = vsel %vm53_vm0, %v224_v3, 0.0  ;;  %v218_v11 = vsel %vm53_vm0, %v210_v4, 0.0  ;;  %872 = vmatpush.xpose.msk.msra.mxu2 %vm53_vm0, %v1208_v8  ;;  %v1235_v15 = vld [vmem:[%s1805_s1 + $0xf0] sm:$0xff] }
   0x5   :  { %v212_v12 = vsel %vm53_vm0, %v208_v5, 0.0  ;;  %888 = vmatpush.xpose.msk.msra.mxu3 %vm53_vm0, %v1213_v9  ;;  %257 = vadd.xlane.f32.xlu2 %v256_v10 }
   0x6   :  { %219 = vadd.xlane.f32.xlu1 %v218_v11 }
   0x7   :  { %12 = vsyncpa [#allocation5], 0  ;;  %213 = vadd.xlane.f32.xlu0 %v212_v12  ;;  %v225_v16 = vmul.f32 %v1198_v6, %v1198_v6  ;;  %v211_v17 = vmul.f32 %v1203_v7, %v1203_v7  ;;  %835 = vmatpush.xpose.msk.msra.mxu0 %vm53_vm0, %v1208_v8  ;;  %v209_v18 = vmul.f32 %v1221_v13, %v1221_v13  ;;  %v1254_v19 = vld [vmem:[%s1805_s1 + $0x68] sm:$0xff]  ;;  %v1269_v24 = vld [vmem:[%s1805_s1 + $0x20] sm:$0xff]  ;;  %vm389_vm1 = vcmask 130112  }
   0x8   :  { %853 = vmatpush.xpose.msk.msra.mxu1 %vm53_vm0, %v1213_v9  ;;  %873 = vmatpush.xpose.msk.msra.mxu2 %vm53_vm0, %v1230_v14  ;;  %v1259_v20 = vld [vmem:[%s1805_s1 + $0xe8] sm:$0xff]  ;;  %v1274_v25 = vld [vmem:[%s1805_s1 + $0x18] sm:$0xff]  ;;  %v1281_v26 = vld [vmem:[%s1805_s1 + $0x10] sm:$0xff]  ;;  %v228_v29 = vmul.f32 %v1269_v24, %v1269_v24  ;;  %vm393_vm2 = vcmask 195712   ;;  %vm397_vm3 = vcmask 261312   ;;  %vm401_vm4 = vcmask 326912  }
   0x9   :  { %889 = vmatpush.xpose.msk.msra.mxu3 %vm53_vm0, %v1235_v15  ;;  %v259_v21 = vsel %vm53_vm0, %v225_v16, 0.0  ;;  %v221_v22 = vsel %vm53_vm0, %v211_v17, 0.0  ;;  %v215_v23 = vsel %vm53_vm0, %v209_v18, 0.0  ;;  %v1290_v27 = vld [vmem:[%s1805_s1 + $0x60] sm:$0xff]  ;;  %v227_v30 = vmul.f32 %v1274_v25, %v1274_v25  ;;  %v1314_v32 = vld [vmem:[%s1805_s1 + $0x58] sm:$0xff]  ;;  %v27_v38 = vld [vmem:[%s1805_s1 + $0x30] sm:$0xff] }
   0xa   :  { %v1295_v28 = vld [vmem:[%s1805_s1 + $0xe0] sm:$0xff]  ;;  %v226_v31 = vmul.f32 %v1281_v26, %v1281_v26  ;;  %v1319_v33 = vld [vmem:[%s1805_s1 + $0xd8] sm:$0xff]  ;;  %v268_v34 = vsel %vm53_vm0, %v228_v29, 0.0  ;;  %v1337_v39 = vld [vmem:[%s1805_s1 + $0x28] sm:$0xff]  ;;  %v230_v42 = vmul.f32 %v27_v38, %v27_v38  ;;  %vm405_vm5 = vcmask 392512  }
   0xb   :  { %836 = vmatpush.xpose.msk.msra.mxu0 %vm53_vm0, %v1230_v14  ;;  %v265_v35 = vsel %vm53_vm0, %v227_v30, 0.0  ;;  %v28_v37 = vld [vmem:[%s1805_s1 + $0x38] sm:$0xff]  ;;  %v1346_v40 = vld [vmem:[%s1805_s1 + $0xd0] sm:$0xff]  ;;  %v229_v43 = vmul.f32 %v1337_v39, %v1337_v39  ;;  %v1363_v45 = vld [vmem:[%s1805_s1 + $0xc8] sm:$0xff]  ;;  %vm409_vm6 = vcmask 458112   ;;  %vm413_vm7 = vcmask 523712  }
   0xc   :  { %854 = vmatpush.xpose.msk.msra.mxu1 %vm53_vm0, %v1235_v15  ;;  %874 = vmatpush.xpose.msk.msra.mxu2 %vm53_vm0, %v1254_v19  ;;  %v262_v36 = vsel %vm53_vm0, %v226_v31, 0.0  ;;  %v231_v41 = vmul.f32 %v28_v37, %v28_v37  ;;  %v31_v44 = vld [vmem:[%s1805_s1 + $0x50] sm:$0xff]  ;;  %v274_v47 = vsel %vm53_vm0, %v230_v42, 0.0  ;;  %v30_v49 = vld [vmem:[%s1805_s1 + $0x48] sm:$0xff]  ;;  %v29_v50 = vld [vmem:[%s1805_s1 + $0x40] sm:$0xff]  ;;  %vm417_vm8 = vcmask 589312  }
   0xd   :  { %890 = vmatpush.xpose.msk.msra.mxu3 %vm53_vm0, %v1259_v20  ;;  %260 = vadd.xlane.f32.xlu2 %v259_v21  ;;  %v271_v48 = vsel %vm53_vm0, %v229_v43, 0.0  ;;  %v45_v51 = vld [vmem:[%s1805_s1 + $0xc0] sm:$0xff]  ;;  %v234_v52 = vmul.f32 %v31_v44, %v31_v44  ;;  %v233_v53 = vmul.f32 %v30_v49, %v30_v49  ;;  %v232_v54 = vmul.f32 %v29_v50, %v29_v50  ;;  %v44_v55 = vld [vmem:[%s1805_s1 + $0xb8] sm:$0xff]  ;;  %v39_v59 = vld [vmem:[%s1805_s1 + $0x90] sm:$0xff] }
   0xe   :  { %222 = vadd.xlane.f32.xlu1 %v221_v22  ;;  %v277_v46 = vsel %vm53_vm0, %v231_v41, 0.0  ;;  %v1401_v60 = vld [vmem:[%s1805_s1 + $0x88] sm:$0xff]  ;;  %v1407_v61 = vld [vmem:[%s1805_s1 + $0x80] sm:$0xff]  ;;  %v43_v62 = vld [vmem:[%s1805_s1 + $0xb0] sm:$0xff]  ;;  %v242_v63 = vmul.f32 %v39_v59, %v39_v59  ;;  %v248_v31 = vmul.f32 %v45_v51, %v45_v51  ;;  %vm421_vm9 = vcmask 654912  }
   0xf   :  { %216 = vadd.xlane.f32.xlu0 %v215_v23  ;;  %837 = vmatpush.xpose.msk.msra.mxu0 %vm53_vm0, %v1254_v19  ;;  %v286_v56 = vsel %vm53_vm0, %v234_v52, 0.0  ;;  %v283_v57 = vsel %vm53_vm0, %v233_v53, 0.0  ;;  %v280_v58 = vsel %vm53_vm0, %v232_v54, 0.0  ;;  %v241_v3 = vmul.f32 %v1401_v60, %v1401_v60  ;;  %v42_v12 = vld [vmem:[%s1805_s1 + $0xa8] sm:$0xff]  ;;  %v41_v16 = vld [vmem:[%s1805_s1 + $0xa0] sm:$0xff]  ;;  %v40_v17 = vld [vmem:[%s1805_s1 + $0x98] sm:$0xff] }
  0x10   :  { %855 = vmatpush.xpose.msk.msra.mxu1 %vm53_vm0, %v1259_v20  ;;  %875 = vmatpush.xpose.msk.msra.mxu2 %vm53_vm0, %v1290_v27  ;;  %v240_v4 = vmul.f32 %v1407_v61, %v1407_v61  ;;  %v310_v5 = vsel %vm53_vm0, %v242_v63, 0.0  ;;  %v245_v18 = vmul.f32 %v42_v12, %v42_v12  ;;  %v244_v21 = vmul.f32 %v41_v16, %v41_v16  ;;  %s1636_s1 = smov 0  }
  0x11   :  { %891 = vmatpush.xpose.msk.msra.mxu3 %vm53_vm0, %v1295_v28  ;;  %v307_v10 = vsel %vm53_vm0, %v241_v3, 0.0  ;;  %v243_v22 = vmul.f32 %v40_v17, %v40_v17  ;;  %vm425_vm10 = vcmask 720512   ;;  %vm429_vm11 = vcmask 786112  }
  0x12   :  { %v304_v11 = vsel %vm53_vm0, %v240_v4, 0.0  ;;  %v319_v23 = vsel %vm53_vm0, %v245_v18, 0.0  ;;  %v316_v29 = vsel %vm53_vm0, %v244_v21, 0.0  ;;  %vm433_vm12 = vcmask 851712  }
  0x13   :  { %838 = vmatpush.xpose.msk.msra.mxu0 %vm53_vm0, %v1290_v27  ;;  %v313_v30 = vsel %vm53_vm0, %v243_v22, 0.0  ;;  %vm437_vm13 = vcmask 917312   ;;  %vm441_vm14 = vcmask 982912   ;;  %vm445_vm15 = vcmask 1048512  }
  0x14   :  { %856 = vmatpush.xpose.msk.msra.mxu1 %vm53_vm0, %v1295_v28  ;;  %876 = vmatpush.xpose.msk.msra.mxu2 %vm53_vm0, %v1314_v32 }
  0x15   :  { %892 = vmatpush.xpose.msk.msra.mxu3 %vm53_vm0, %v1319_v33  ;;  %269 = vadd.xlane.f32.xlu2 %v268_v34  ;;  %v247_v34 = vmul.f32 %v44_v55, %v44_v55 }
  0x16   :  { %266 = vadd.xlane.f32.xlu1 %v265_v35  ;;  %v246_v35 = vmul.f32 %v43_v62, %v43_v62 }
  0x17   :  { %263 = vadd.xlane.f32.xlu0 %v262_v36  ;;  %839 = vmatpush.xpose.msk.msra.mxu0 %vm53_vm0, %v1314_v32  ;;  %v325_v36 = vsel %vm53_vm0, %v247_v34, 0.0 }
  0x18   :  { %857 = vmatpush.xpose.msk.msra.mxu1 %vm53_vm0, %v1319_v33  ;;  %877 = vmatpush.xpose.msk.msra.mxu2 %vm53_vm0, %v31_v44 }
  0x19   :  { %893 = vmatpush.xpose.msk.msra.mxu3 %vm53_vm0, %v1346_v40 }
  0x1b   :  { %840 = vmatpush.xpose.msk.msra.mxu0 %vm53_vm0, %v31_v44  ;;  %v239_v44 = vmul.f32 %v1208_v8, %v1208_v8 }
  0x1c   :  { %858 = vmatpush.xpose.msk.msra.mxu1 %vm53_vm0, %v1346_v40  ;;  %878 = vmatpush.xpose.msk.msra.mxu2 %vm53_vm0, %v30_v49 }
  0x1d   :  { %894 = vmatpush.xpose.msk.msra.mxu3 %vm53_vm0, %v1363_v45  ;;  %278 = vadd.xlane.f32.xlu2 %v277_v46 }
  0x1e   :  { %275 = vadd.xlane.f32.xlu1 %v274_v47  ;;  %v384_v47 = vlaneseq }
  0x1f   :  { %272 = vadd.xlane.f32.xlu0 %v271_v48  ;;  %841 = vmatpush.xpose.msk.msra.mxu0 %vm53_vm0, %v30_v49 }
  0x20   :  { %859 = vmatpush.xpose.msk.msra.mxu1 %vm53_vm0, %v1363_v45  ;;  %879 = vmatpush.xpose.msk.msra.mxu2 %vm53_vm0, %v29_v50 }
  0x21   :  { %895 = vmatpush.xpose.msk.msra.mxu3 %vm53_vm0, %v45_v51 }
  0x23   :  { %842 = vmatpush.xpose.msk.msra.mxu0 %vm53_vm0, %v29_v50  ;;  %v1530_v50 = vand.u32 127, %v384_v47 }
  0x24   :  { %860 = vmatpush.xpose.msk.msra.mxu1 %vm53_vm0, %v45_v51  ;;  %880 = vmatpush.xpose.msk.msra.mxu2 %vm53_vm0, %v28_v37 }
  0x25   :  { %896 = vmatpush.xpose.msk.msra.mxu3 %vm53_vm0, %v44_v55  ;;  %287 = vadd.xlane.f32.xlu2 %v286_v56  ;;  %v399_v34 = vadd.s32 4294967264, %v1530_v50 }
  0x26   :  { %284 = vadd.xlane.f32.xlu1 %v283_v57 }
  0x27   :  { %281 = vadd.xlane.f32.xlu0 %v280_v58  ;;  %843 = vmatpush.xpose.msk.msra.mxu0 %vm53_vm0, %v28_v37  ;;  %v322_v37 = vsel %vm53_vm0, %v246_v35, 0.0 }
  0x28   :  { %861 = vmatpush.xpose.msk.msra.mxu1 %vm53_vm0, %v44_v55  ;;  %881 = vmatpush.xpose.msk.msra.mxu2 %vm53_vm0, %v27_v38 }
  0x29   :  { %897 = vmatpush.xpose.msk.msra.mxu3 %vm53_vm0, %v43_v62 }
  0x2b   :  { %844 = vmatpush.xpose.msk.msra.mxu0 %vm53_vm0, %v27_v38  ;;  %v250_v38 = vmul.f32 %v1346_v40, %v1346_v40  ;;  %v236_v40 = vmul.f32 %v1290_v27, %v1290_v27  ;;  %v253_v27 = vmul.f32 %v1259_v20, %v1259_v20  ;;  %v255_v20 = vmul.f32 %v1213_v9, %v1213_v9 }
  0x2c   :  { %862 = vmatpush.xpose.msk.msra.mxu1 %vm53_vm0, %v43_v62  ;;  %882 = vmatpush.xpose.msk.msra.mxu2 %vm53_vm0, %v1337_v39  ;;  %v387_v9 = vadd.s32 4294967288, %v1530_v50 }
  0x2d   :  { %898 = vmatpush.xpose.msk.msra.mxu3 %vm53_vm0, %v42_v12  ;;  %311 = vadd.xlane.f32.xlu2 %v310_v5 }
  0x2e   :  { %308 = vadd.xlane.f32.xlu1 %v307_v10 }
  0x2f   :  { %305 = vadd.xlane.f32.xlu0 %v304_v11  ;;  %845 = vmatpush.xpose.msk.msra.mxu0 %vm53_vm0, %v1337_v39  ;;  %v334_v39 = vsel %vm53_vm0, %v250_v38, 0.0 }
  0x30   :  { %863 = vmatpush.xpose.msk.msra.mxu1 %vm53_vm0, %v42_v12  ;;  %883 = vmatpush.xpose.msk.msra.mxu2 %vm53_vm0, %v1269_v24 }
  0x31   :  { %899 = vmatpush.xpose.msk.msra.mxu3 %vm53_vm0, %v41_v16 }
  0x33   :  { %846 = vmatpush.xpose.msk.msra.mxu0 %vm53_vm0, %v1269_v24  ;;  %v328_v24 = vsel %vm53_vm0, %v248_v31, 0.0 }
  0x34   :  { %864 = vmatpush.xpose.msk.msra.mxu1 %vm53_vm0, %v41_v16  ;;  %884 = vmatpush.xpose.msk.msra.mxu2 %vm53_vm0, %v1274_v25 }
  0x35   :  { %900 = vmatpush.xpose.msk.msra.mxu3 %vm53_vm0, %v40_v17  ;;  %320 = vadd.xlane.f32.xlu2 %v319_v23  ;;  %v395_v23 = vadd.s32 4294967272, %v1530_v50 }
  0x36   :  { %317 = vadd.xlane.f32.xlu1 %v316_v29 }
  0x37   :  { %314 = vadd.xlane.f32.xlu0 %v313_v30  ;;  %847 = vmatpush.xpose.msk.msra.mxu0 %vm53_vm0, %v1274_v25  ;;  %v235_v25 = vmul.f32 %v1314_v32, %v1314_v32 }
  0x38   :  { %865 = vmatpush.xpose.msk.msra.mxu1 %vm53_vm0, %v40_v17  ;;  %885 = vmatpush.xpose.msk.msra.mxu2 %vm53_vm0, %v1281_v26  ;;  %v391_v17 = vadd.s32 4294967280, %v1530_v50 }
  0x39   :  { %901 = vmatpush.xpose.msk.msra.mxu3 %vm53_vm0, %v39_v59  ;;  %v289_v32 = vsel %vm53_vm0, %v235_v25, 0.0 }
  0x3b   :  { %848 = vmatpush.xpose.msk.msra.mxu0 %vm53_vm0, %v1281_v26  ;;  %v249_v26 = vmul.f32 %v1363_v45, %v1363_v45  ;;  %v349_v45 = vsel %vm53_vm0, %v255_v20, 0.0 }
  0x3c   :  { %866 = vmatpush.xpose.msk.msra.mxu1 %vm53_vm0, %v39_v59  ;;  %886 = vmatpush.xpose.msk.msra.mxu2 %vm53_vm0, %v1198_v6 }
  0x3d   :  { %902 = vmatpush.xpose.msk.msra.mxu3 %vm53_vm0, %v1401_v60  ;;  %329 = vadd.xlane.f32.xlu2 %v328_v24  ;;  %v403_v24 = vadd.s32 4294967256, %v1530_v50 }
  0x3e   :  { %326 = vadd.xlane.f32.xlu1 %v325_v36 }
  0x3f   :  { %323 = vadd.xlane.f32.xlu0 %v322_v37  ;;  %849 = vmatpush.xpose.msk.msra.mxu0 %vm53_vm0, %v1198_v6  ;;  %v331_v6 = vsel %vm53_vm0, %v249_v26, 0.0 }
  0x40   :  { %867 = vmatpush.xpose.msk.msra.mxu1 %vm53_vm0, %v1401_v60  ;;  %887 = vmatpush.xpose.msk.msra.mxu2 %vm53_vm0, %v1177_v0 }
  0x41   :  { %903 = vmatpush.xpose.msk.msra.mxu3 %vm53_vm0, %v1407_v61 }
  0x43   :  { %850 = vmatpush.xpose.msk.msra.mxu0 %vm53_vm0, %v1177_v0  ;;  %852 = vmatmul.msk.f32.vlgmr.msra.gmra.mxu2 %vm53_vm0, %v1221_v13  ;;  %v252_v0 = vmul.f32 %v1295_v28, %v1295_v28  ;;  %v251_v13 = vmul.f32 %v1319_v33, %v1319_v33  ;;  %v237_v28 = vmul.f32 %v1254_v19, %v1254_v19  ;;  %v301_v19 = vsel %vm53_vm0, %v239_v44, 0.0 }
  0x44   :  { %870 = vmatmul.msk.f32.vlgmr.msra.gmra.mxu3 %vm53_vm0, %v1203_v7  ;;  %868 = vmatpush.xpose.msk.msra.mxu1 %vm53_vm0, %v1407_v61  ;;  %v292_v7 = vsel %vm53_vm0, %v236_v40, 0.0  ;;  %v407_v40 = vadd.s32 4294967248, %v1530_v50 }
  0x45   :  { %290 = vadd.xlane.f32.xlu2 %v289_v32  ;;  %v340_v41 = vsel %vm53_vm0, %v252_v0, 0.0  ;;  %v337_v42 = vsel %vm53_vm0, %v251_v13, 0.0  ;;  %v295_v43 = vsel %vm53_vm0, %v237_v28, 0.0 }
  0x46   :  { %335 = vadd.xlane.f32.xlu1 %v334_v39  ;;  %851 = vmatmul.msk.f32.vlgmr.msra.gmra.mxu0 %vm53_vm0, %v1187_v2  ;;  %v238_v2 = vmul.f32 %v1230_v14, %v1230_v14  ;;  %v254_v14 = vmul.f32 %v1235_v15, %v1235_v15 }
  0x47   :  { %332 = vadd.xlane.f32.xlu0 %v331_v6  ;;  %869 = vmatmul.msk.f32.vlgmr.msra.gmra.mxu1 %vm53_vm0, %v1182_v1  ;;  %v343_v1 = vsel %vm53_vm0, %v253_v27, 0.0 }
  0x48   :  { %v298_v33 = vsel %vm53_vm0, %v238_v2, 0.0  ;;  %v346_v46 = vsel %vm53_vm0, %v254_v14, 0.0  ;;  %vm523_vm0 = vcmp.lt.s32.totalorder %v1530_v50, 8 }
  0x4d   :  { %341 = vadd.xlane.f32.xlu2 %v340_v41 }
  0x4e   :  { %293 = vadd.xlane.f32.xlu1 %v292_v7 }
  0x4f   :  { %338 = vadd.xlane.f32.xlu0 %v337_v42  ;;  %v411_v42 = vadd.s32 4294967240, %v1530_v50 }
  0x55   :  { %299 = vadd.xlane.f32.xlu2 %v298_v33 }
  0x56   :  { %344 = vadd.xlane.f32.xlu1 %v343_v1  ;;  %v415_v1 = vadd.s32 4294967232, %v1530_v50 }
  0x57   :  { %296 = vadd.xlane.f32.xlu0 %v295_v43 }
  0x5d   :  { %350 = vadd.xlane.f32.xlu2 %v349_v45 }
  0x5e   :  { %302 = vadd.xlane.f32.xlu1 %v301_v19 }
  0x5f   :  { %347 = vadd.xlane.f32.xlu0 %v346_v46  ;;  %v419_v46 = vadd.s32 4294967224, %v1530_v50 }
  0x78   :  { %v258_v48 = vpop.xlane.xlu2 %257 }
  0x79   :  { %v1526_v49 = vpop.xlane.xlu1 %219  ;;  %v386_v52 = vperm.slane %v258_v48, %v1530_v50 }
  0x7a   :  { %v1528_v8 = vpop.xlane.xlu0 %213 }
  0x80   :  { %v261_v15 = vpop.xlane.xlu2 %260 }
  0x81   :  { %v1533_v51 = vpop.xlane.xlu1 %222  ;;  %v388_v53 = vperm.slane %v261_v15, %v387_v9 }
  0x82   :  { %v1536_v54 = vpop.xlane.xlu0 %216 }
  0x83   :  { %v390_v55 = vsel %vm389_vm1, %v388_v53, %v386_v52  ;;  %v423_v53 = vadd.s32 4294967216, %v1530_v50 }
  0x88   :  { %v270_v56 = vpop.xlane.xlu2 %269 }
  0x89   :  { %v267_v57 = vpop.xlane.xlu1 %266  ;;  %v400_v6 = vperm.slane %v270_v56, %v399_v34 }
  0x8a   :  { %v264_v58 = vpop.xlane.xlu0 %263  ;;  %v396_v35 = vperm.slane %v267_v57, %v395_v23 }
  0x8b   :  { %v392_v29 = vperm.slane %v264_v58, %v391_v17  ;;  %v427_v58 = vadd.s32 4294967208, %v1530_v50 }
  0x8d   :  { %v394_v36 = vsel %vm393_vm2, %v392_v29, %v390_v55 }
  0x8e   :  { %v398_v0 = vsel %vm397_vm3, %v396_v35, %v394_v36  ;;  %v443_v35 = vadd.s32 4294967176, %v1530_v50 }
  0x8f   :  { %v402_v28 = vsel %vm401_vm4, %v400_v6, %v398_v0 }
  0x90   :  { %v1539_v59 = vpop.xlane.xlu2 %278 }
  0x91   :  { %v276_v60 = vpop.xlane.xlu1 %275  ;;  %v412_v45 = vperm.slane %v1539_v59, %v411_v42 }
  0x92   :  { %v273_v61 = vpop.xlane.xlu0 %272  ;;  %v408_v2 = vperm.slane %v276_v60, %v407_v40 }
  0x93   :  { %v404_v13 = vperm.slane %v273_v61, %v403_v24  ;;  %v431_v61 = vadd.s32 4294967200, %v1530_v50 }
  0x95   :  { %v406_v33 = vsel %vm405_vm5, %v404_v13, %v402_v28 }
  0x96   :  { %v410_v48 = vsel %vm409_vm6, %v408_v2, %v406_v33 }
  0x97   :  { %v414_v57 = vsel %vm413_vm7, %v412_v45, %v410_v48 }
  0x98   :  { %v1541_v62 = vpop.xlane.xlu2 %287 }
  0x99   :  { %v1543_v63 = vpop.xlane.xlu1 %284 }
  0x9a   :  { %v1545_v3 = vpop.xlane.xlu0 %281  ;;  %v420_v56 = vperm.slane %v1543_v63, %v419_v46 }
  0xa0   :  { %v312_v4 = vpop.xlane.xlu2 %311 }
  0xa1   :  { %v309_v5 = vpop.xlane.xlu1 %308  ;;  %v450_v37 = vperm.slane %v312_v4, %v391_v17 }
  0xa2   :  { %v306_v10 = vpop.xlane.xlu0 %305  ;;  %v448_v30 = vperm.slane %v309_v5, %v387_v9  ;;  %v416_v9 = vperm.slane %v1545_v3, %v415_v1  ;;  %v435_v5 = vadd.s32 4294967192, %v1530_v50 }
  0xa3   :  { %v447_v31 = vperm.slane %v306_v10, %v1530_v50  ;;  %v424_v10 = vperm.slane %v1541_v62, %v423_v53 }
  0xa4   :  { %v418_v59 = vsel %vm417_vm8, %v416_v9, %v414_v57 }
  0xa5   :  { %v449_v26 = vsel %vm389_vm1, %v448_v30, %v447_v31  ;;  %v422_v63 = vsel %vm421_vm9, %v420_v56, %v418_v59 }
  0xa6   :  { %v451_v41 = vsel %vm393_vm2, %v450_v37, %v449_v26  ;;  %v426_v31 = vsel %vm425_vm10, %v424_v10, %v422_v63  ;;  %v1632_v10 = vmov 0.0  }
  0xa8   :  { %v321_v11 = vpop.xlane.xlu2 %320 }
  0xa9   :  { %v318_v12 = vpop.xlane.xlu1 %317  ;;  %v456_v43 = vperm.slane %v321_v11, %v403_v24 }
  0xaa   :  { %v315_v16 = vpop.xlane.xlu0 %314  ;;  %v454_v7 = vperm.slane %v318_v12, %v399_v34 }
  0xab   :  { %v452_v32 = vperm.slane %v315_v16, %v395_v23  ;;  %v439_v23 = vadd.s32 4294967184, %v1530_v50 }
  0xad   :  { %v453_v27 = vsel %vm397_vm3, %v452_v32, %v451_v41 }
  0xae   :  { %v455_v44 = vsel %vm401_vm4, %v454_v7, %v453_v27 }
  0xaf   :  { %v457_v52 = vsel %vm405_vm5, %v456_v43, %v455_v44 }
  0xb0   :  { %v1548_v18 = vpop.xlane.xlu2 %329 }
  0xb1   :  { %v327_v21 = vpop.xlane.xlu1 %326  ;;  %v462_v60 = vperm.slane %v1548_v18, %v415_v1 }
  0xb2   :  { %v324_v22 = vpop.xlane.xlu0 %323  ;;  %v460_v15 = vperm.slane %v327_v21, %v411_v42 }
  0xb3   :  { %v458_v20 = vperm.slane %v324_v22, %v407_v40 }
  0xb5   :  { %v459_v55 = vsel %vm409_vm6, %v458_v20, %v457_v52 }
  0xb6   :  { %v461_v3 = vsel %vm413_vm7, %v460_v15, %v459_v55 }
  0xb7   :  { %v463_v18 = vsel %vm417_vm8, %v462_v60, %v461_v3  ;;  %v1626_v3 = vmov 0.0  }
  0xb8   :  { %v1555_v25 = vpop.xlane.xlu2 %290 }
  0xb9   :  { %v1557_v38 = vpop.xlane.xlu1 %335  ;;  %v428_v16 = vperm.slane %v1555_v25, %v427_v58 }
  0xba   :  { %v333_v39 = vpop.xlane.xlu0 %332  ;;  %v466_v21 = vperm.slane %v1557_v38, %v423_v53 }
  0xbb   :  { %v464_v4 = vperm.slane %v333_v39, %v419_v46  ;;  %v430_v34 = vsel %vm429_vm11, %v428_v16, %v426_v31 }
  0xbd   :  { %v465_v29 = vsel %vm421_vm9, %v464_v4, %v463_v18  ;;  %v1628_v4 = vmov 0.0  }
  0xbe   :  { %v467_v36 = vsel %vm425_vm10, %v466_v21, %v465_v29 }
  0xc0   :  { %v1567_v19 = vpop.xlane.xlu2 %341 }
  0xc1   :  { %v294_v14 = vpop.xlane.xlu1 %293  ;;  %v470_v37 = vperm.slane %v1567_v19, %v431_v61 }
  0xc2   :  { %v339_v47 = vpop.xlane.xlu0 %338  ;;  %v432_v22 = vperm.slane %v294_v14, %v431_v61  ;;  %v1624_v61 = vmov 0.0  }
  0xc3   :  { %v468_v62 = vperm.slane %v339_v47, %v427_v58  ;;  %v125_v38 = vpop.f32.mrf.mxu0 }
  0xc4   :  { %v434_v24 = vsel %vm433_vm12, %v432_v22, %v430_v34  ;;  %v202_v40 = vpop.f32.mrf.mxu1  ;;  %v502_v27 = vmul.f32 2.0, %v125_v38 }
  0xc5   :  { %v469_v26 = vsel %vm429_vm11, %v468_v62, %v467_v36  ;;  %v504_v14 = vmul.f32 2.0, %v202_v40 }
  0xc6   :  { %v128_v6 = vpop.f32.mrf.mxu2  ;;  %v471_v28 = vsel %vm433_vm12, %v470_v37, %v469_v26 }
  0xc7   :  { %v205_v2 = vpop.f32.mrf.mxu3  ;;  %v503_v43 = vmul.f32 2.0, %v128_v6 }
  0xc8   :  { %v300_v12 = vpop.xlane.xlu2 %299  ;;  %v505_v47 = vmul.f32 2.0, %v205_v2 }
  0xc9   :  { %v345_v11 = vpop.xlane.xlu1 %344  ;;  %v440_v25 = vperm.slane %v300_v12, %v439_v23 }
  0xca   :  { %v297_v17 = vpop.xlane.xlu0 %296  ;;  %v472_v32 = vperm.slane %v345_v11, %v435_v5  ;;  %v1634_v11 = vmov 0.0  }
  0xcb   :  { %v436_v30 = vperm.slane %v297_v17, %v435_v5  ;;  %v1630_v5 = vmov 0.0  }
  0xcc   :  { %v473_v44 = vsel %vm437_vm13, %v472_v32, %v471_v28 }
  0xcd   :  { %v438_v39 = vsel %vm437_vm13, %v436_v30, %v434_v24 }
  0xce   :  { %v442_v1 = vsel %vm441_vm14, %v440_v25, %v438_v39 }
  0xd0   :  { %v351_v13 = vpop.xlane.xlu2 %350 }
  0xd1   :  { %v303_v0 = vpop.xlane.xlu1 %302  ;;  %v476_v42 = vperm.slane %v351_v13, %v443_v35 }
  0xd2   :  { %v444_v7 = vperm.slane %v303_v0, %v443_v35  ;;  %v348_v41 = vpop.xlane.xlu0 %347 }
  0xd3   :  { %v474_v33 = vperm.slane %v348_v41, %v439_v23 }
  0xd4   :  { %v446_v20 = vsel %vm445_vm15, %v444_v7, %v442_v1 }
  0xd5   :  { %v475_v19 = vsel %vm441_vm14, %v474_v33, %v473_v44  ;;  %v498_v45 = vadd.f32 %v446_v20, %v1528_v8  ;;  %v499_v46 = vadd.f32 %v446_v20, %v1536_v54 }
  0xd6   :  { %v477_v48 = vsel %vm445_vm15, %v476_v42, %v475_v19 }
  0xd7   :  { %v506_v9 = vsub.f32 %v498_v45, %v502_v27  ;;  %v507_v15 = vsub.f32 %v499_v46, %v503_v43  ;;  %v500_v52 = vadd.f32 %v477_v48, %v1526_v49  ;;  %v501_v53 = vadd.f32 %v477_v48, %v1533_v51 }
  0xd9   :  { %510 = vst [vmem:[#allocation4] sm:$0xff] %v506_v9  ;;  %v514_v55 = vmul.f32 -10.0, %v506_v9  ;;  %v515_v56 = vmul.f32 -10.0, %v507_v15  ;;  %v508_v57 = vsub.f32 %v500_v52, %v504_v14  ;;  %v509_v58 = vsub.f32 %v501_v53, %v505_v47 }
  0xda   :  { %511 = vst [vmem:[#allocation4 + $0x8] sm:$0xff] %v507_v15 }
  0xdb   :  { %v1610_v8 = vsel %vm523_vm0, %v514_v55, -1e+30  ;;  %v1614_v54 = vsel %vm523_vm0, %v515_v56, -1e+30  ;;  %512 = vst [vmem:[#allocation4 + $0x10] sm:$0xff] %v508_v57  ;;  %v516_v49 = vmul.f32 -10.0, %v508_v57 }
  0xdc   :  { %513 = vst [vmem:[#allocation4 + $0x18] sm:$0xff] %v509_v58  ;;  %v517_v51 = vmul.f32 -10.0, %v509_v58 }
  0xdd   :  { %v1618_v59 = vsel %vm523_vm0, %v516_v49, -1e+30 }
  0xde   :  { %v1622_v60 = vsel %vm523_vm0, %v517_v51, -1e+30 }
  0xdf LB: > { %v549_v12 = vmul.f32 10.0, %v1131_v11  ;;  %v1661_v63 = vmul.f32 10.0, %v1115_v3  ;;  %v551_v16 = vmul.f32 10.0, %v1123_v5  ;;  %v1665_v17 = vmul.f32 10.0, %v1111_v61  ;;  %s718_s0 = sadd.s32 1, %s1135_s1   ;;  %p642_p0 = scmp.lt.s32.totalorder %s1135_s1, 25  ;;  %s1135_s1 = sphi %s1636_s1, %s1818_s1   ;;  %v1131_v11 = vphi %v1634_v11, %v1817_v11   ;;  %v1127_v10 = vphi %v1632_v10, %v1816_v10   ;;  %v1123_v5 = vphi %v1630_v5, %v1815_v5   ;;  %v1119_v4 = vphi %v1628_v4, %v1814_v4   ;;  %v1115_v3 = vphi %v1626_v3, %v1813_v3   ;;  %v1111_v61 = vphi %v1624_v61, %v1812_v61  }
  0xe0   : > { %v550_v22 = vmul.f32 10.0, %v1127_v10  ;;  %v552_v23 = vmul.f32 10.0, %v1119_v4  ;;  %vm623_vm1 = vcmask 7168   ;;  %p543_p3 = scmp.lt.s32.totalorder %s718_s0, 25  ;;  %s1818_s1 = smov %s718_s0 }
  0xe1   : > { %v553_v21 = vadd.f32 %v549_v12, %v1610_v8  ;;  %v555_v18 = vadd.f32 %v551_v16, %v1618_v59 }
  0xe2   : > { %v554_v30 = vadd.f32 %v550_v22, %v1614_v54  ;;  %v556_v31 = vadd.f32 %v552_v23, %v1622_v60 }
  0xe3   : > { %v559_v29 = vadd.f32 %v1661_v63, %v553_v21  ;;  %v561_v62 = vadd.f32 %v1665_v17, %v555_v18 }
  0xe4   : > { %v560_v34 = vadd.f32 %v1661_v63, %v554_v30  ;;  %v562_v35 = vadd.f32 %v1665_v17, %v556_v31 }
  0xe5   : > { %563 = vmax.xlane.f32.xlu0 %v559_v29  ;;  %567 = vmax.xlane.f32.xlu1 %v561_v62 }
  0xed   : > { %565 = vmax.xlane.f32.xlu0 %v560_v34  ;;  %569 = vmax.xlane.f32.xlu1 %v562_v35 }
 0x158   : > { %v564_v24 = vpop.xlane.xlu0 %563  ;;  %v568_v36 = vpop.xlane.xlu1 %567 }
 0x159   : > { %v571_v37 = vsub.f32 %v559_v29, %v564_v24  ;;  %v573_v25 = vsub.f32 %v561_v62, %v568_v36 }
 0x15b   : > { %v579_v38 = vmul.f32 1.442695, %v573_v25  ;;  %v575_v26 = vmul.f32 1.442695, %v571_v37 }
 0x15d   : > { %969 = vpow2.f32 %v579_v38 }
 0x15e   : > { %971 = vpow2.f32 %v575_v26 }
 0x160   : > { %v566_v32 = vpop.xlane.xlu0 %565  ;;  %v570_v39 = vpop.xlane.xlu1 %569 }
 0x161   : > { %v572_v6 = vsub.f32 %v560_v34, %v566_v32  ;;  %v574_v40 = vsub.f32 %v562_v35, %v570_v39 }
 0x163   : > { %v970_v0 = vpop.eup %969  ;;  %v577_v13 = vmul.f32 1.442695, %v572_v6  ;;  %v581_v7 = vmul.f32 1.442695, %v574_v40 }
 0x164   : > { %v972_v41 = vpop.eup %971  ;;  %587 = vadd.xlane.f32.xlu0 %v970_v0 }
 0x165   : > { %973 = vpow2.f32 %v577_v13  ;;  %583 = vadd.xlane.f32.xlu2 %v972_v41 }
 0x166   : > { %975 = vpow2.f32 %v581_v7 }
 0x16b   : > { %v974_v42 = vpop.eup %973 }
 0x16c   : > { %v976_v27 = vpop.eup %975 }
 0x16d   : > { %585 = vadd.xlane.f32.xlu2 %v974_v42  ;;  %589 = vadd.xlane.f32.xlu1 %v976_v27 }
 0x1d7   : > { %v588_v2 = vpop.xlane.xlu0 %587 }
 0x1d8   : > { %v584_v28 = vpop.xlane.xlu2 %583  ;;  %977 = vlog2.f32 %v588_v2 }
 0x1d9   : > { %979 = vlog2.f32 %v584_v28 }
 0x1de   : > { %v978_v1 = vpop.eup %977 }
 0x1df   : > { %v980_v33 = vpop.eup %979  ;;  %v596_v43 = vmul.f32 0.6931472, %v978_v1 }
 0x1e0   : > { %v592_v44 = vmul.f32 0.6931472, %v980_v33  ;;  %v586_v20 = vpop.xlane.xlu2 %585  ;;  %v590_v14 = vpop.xlane.xlu1 %589 }
 0x1e1   : > { %v601_v19 = vadd.f32 %v596_v43, %v568_v36  ;;  %981 = vlog2.f32 %v586_v20 }
 0x1e2   : > { %v599_v45 = vadd.f32 %v592_v44, %v564_v24  ;;  %983 = vlog2.f32 %v590_v14 }
 0x1e3   : > { %v605_v46 = vsub.f32 -2.7725887, %v601_v19 }
 0x1e4   : > { %v603_v47 = vsub.f32 -2.7725887, %v599_v45 }
 0x1e5   : > { %v609_v15 = vmul.f32 0.1, %v605_v46 }
 0x1e6   : > { %v607_v48 = vmul.f32 0.1, %v603_v47 }
 0x1e7   : > { %v982_v9 = vpop.eup %981  ;;  %v1681_v58 = vadd.f32 %v1123_v5, %v609_v15  }
 0x1e8   : > { %v984_v52 = vpop.eup %983  ;;  %v594_v53 = vmul.f32 0.6931472, %v982_v9  ;;  %v1678_v55 = vadd.f32 %v1131_v11, %v607_v48  }
 0x1e9   : > { %v598_v56 = vmul.f32 0.6931472, %v984_v52  ;;  %v647_v22 = vmul.f32 10.0, %v1681_v58  ;;  %v617_v62 = vsub.f32 %v1681_v58, %v1123_v5 }
 0x1ea   : > { %v600_v57 = vadd.f32 %v594_v53, %v566_v32  ;;  %v645_v12 = vmul.f32 10.0, %v1678_v55  ;;  %v615_v18 = vsub.f32 %v1678_v55, %v1131_v11 }
 0x1eb   : > { %v602_v49 = vadd.f32 %v598_v56, %v570_v39  ;;  %v1702_v24 = vadd.f32 %v647_v22, %v1618_v59  ;;  %v621_v38 = vand.u32 2147483647, %v617_v62 }
 0x1ec   : > { %v604_v51 = vsub.f32 -2.7725887, %v600_v57  ;;  %v1693_v30 = vadd.f32 %v645_v12, %v1610_v8  ;;  %v619_v35 = vand.u32 2147483647, %v615_v18 }
 0x1ed   : > { %v606_v16 = vsub.f32 -2.7725887, %v602_v49  ;;  %v655_v0 = vadd.f32 %v1702_v24, %v1665_v17  ;;  %v627_v42 = vsel %vm623_vm1, %v621_v38, 0.0 }
 0x1ee   : > { %v608_v21 = vmul.f32 0.1, %v604_v51  ;;  %v653_v26 = vadd.f32 %v1693_v30, %v1661_v63  ;;  %v624_v40 = vsel %vm623_vm1, %v619_v35, 0.0 }
 0x1ef   : > { %v610_v23 = vmul.f32 0.1, %v606_v16 }
 0x1f0   : > { %v1688_v29 = vadd.f32 %v1127_v10, %v608_v21  }
 0x1f1   : > { %v1696_v31 = vadd.f32 %v1119_v4, %v610_v23  }
 0x1f2   : > { %v646_v34 = vmul.f32 10.0, %v1688_v29  ;;  %v616_v11 = vsub.f32 %v1688_v29, %v1127_v10 }
 0x1f3   : > { %v648_v36 = vmul.f32 10.0, %v1696_v31  ;;  %v618_v5 = vsub.f32 %v1696_v31, %v1119_v4 }
 0x1f4   : > { %v1708_v37 = vadd.f32 %v646_v34, %v1614_v54  ;;  %v620_v25 = vand.u32 2147483647, %v616_v11 }
 0x1f5   : > { %v1713_v10 = vadd.f32 %v648_v36, %v1622_v60  ;;  %v622_v6 = vand.u32 2147483647, %v618_v5 }
 0x1f6   : > { %v654_v39 = vadd.f32 %v1708_v37, %v1661_v63  ;;  %v625_v4 = vsel %vm623_vm1, %v620_v25, 0.0 }
 0x1f7   : > { %v1810_v32 = vmov %v1713_v10  ;;  %v626_v7 = vadd.f32 %v625_v4, %v624_v40  ;;  %v629_v63 = vsel %vm623_vm1, %v622_v6, 0.0 }
 0x1f8   : > { %v656_v13 = vadd.f32 %v1810_v32, %v1665_v17  ;;  %v657_v41 = vmax.f32 %v653_v26, %v654_v39 }
 0x1f9   : > { %v628_v2 = vadd.f32 %v627_v42, %v626_v7 }
 0x1fa   : > { %v664_v27 = vmax.f32 %v655_v0, %v656_v13  ;;  %v658_v28 = vrot.slane %v657_v41, 4 }
 0x1fb   : > { %v630_v33 = vadd.f32 %v629_v63, %v628_v2 }
 0x1fc   : > { %v665_v1 = vrot.slane %v664_v27, 4  ;;  %v659_v43 = vmax.f32 %v657_v41, %v658_v28 }
 0x1fd   : > { %631 = vadd.xlane.f32.xlu2 %v630_v33 }
 0x1fe   : > { %v666_v44 = vmax.f32 %v664_v27, %v665_v1  ;;  %v660_v20 = vrot.slane %v659_v43, 2 }
 0x200   : > { %v667_v14 = vrot.slane %v666_v44, 2  ;;  %v661_v19 = vmax.f32 %v659_v43, %v660_v20 }
 0x202   : > { %v668_v45 = vmax.f32 %v666_v44, %v667_v14  ;;  %v662_v46 = vrot.slane %v661_v19, 1 }
 0x204   : > { %v669_v17 = vrot.slane %v668_v45, 1  ;;  %v663_v47 = vmax.f32 %v661_v19, %v662_v46 }
 0x206   : > { %v670_v48 = vmax.f32 %v668_v45, %v669_v17  ;;  %v671_v9 = vsub.f32 %v653_v26, %v663_v47  ;;  %v672_v15 = vsub.f32 %v654_v39, %v663_v47 }
 0x208   : > { %v673_v52 = vsub.f32 %v655_v0, %v670_v48  ;;  %v674_v53 = vsub.f32 %v656_v13, %v670_v48  ;;  %v675_v56 = vmul.f32 1.442695, %v671_v9  ;;  %v677_v57 = vmul.f32 1.442695, %v672_v15 }
 0x20a   : > { %v679_v49 = vmul.f32 1.442695, %v673_v52  ;;  %v681_v51 = vmul.f32 1.442695, %v674_v53  ;;  %985 = vpow2.f32 %v675_v56 }
 0x20b   : > { %987 = vpow2.f32 %v677_v57 }
 0x20c   : > { %989 = vpow2.f32 %v679_v49 }
 0x20d   : > { %991 = vpow2.f32 %v681_v51 }
 0x210   : > { %v986_v12 = vpop.eup %985 }
 0x211   : > { %v988_v16 = vpop.eup %987 }
 0x212   : > { %v990_v21 = vpop.eup %989  ;;  %v683_v18 = vadd.f32 %v988_v16, %v986_v12 }
 0x213   : > { %v992_v22 = vpop.eup %991 }
 0x214   : > { %v690_v23 = vadd.f32 %v992_v22, %v990_v21  ;;  %v684_v62 = vrot.slane %v683_v18, 4 }
 0x216   : > { %v685_v34 = vadd.f32 %v684_v62, %v683_v18  ;;  %v691_v11 = vrot.slane %v690_v23, 4 }
 0x218   : > { %v686_v35 = vrot.slane %v685_v34, 2  ;;  %v692_v36 = vadd.f32 %v691_v11, %v690_v23  ;;  %v1817_v11 = vmov %v1678_v55 }
 0x21a   : > { %v687_v5 = vadd.f32 %v686_v35, %v685_v34  ;;  %v693_v25 = vrot.slane %v692_v36, 2 }
 0x21c   : > { %v688_v38 = vrot.slane %v687_v5, 1  ;;  %v694_v26 = vadd.f32 %v693_v25, %v692_v36 }
 0x21e   : > { %v689_v10 = vadd.f32 %v688_v38, %v687_v5  ;;  %v695_v39 = vrot.slane %v694_v26, 1  ;;  %v1815_v5 = vmov %v1681_v58 }
 0x220   : > { %v696_v6 = vadd.f32 %v695_v39, %v694_v26  ;;  %993 = vlog2.f32 %v689_v10  ;;  %v1816_v10 = vmov %v1688_v29 }
 0x222   : > { %995 = vlog2.f32 %v696_v6 }
 0x226   : > { %v994_v40 = vpop.eup %993 }
 0x227   : > { %v698_v4 = vmul.f32 0.6931472, %v994_v40 }
 0x228   : > { %v996_v0 = vpop.eup %995 }
 0x229   : > { %v700_v13 = vmul.f32 0.6931472, %v996_v0  ;;  %v701_v7 = vadd.f32 %v698_v4, %v663_v47  ;;  %v1814_v4 = vmov %v1696_v31 }
 0x22b   : > { %v702_v41 = vadd.f32 %v700_v13, %v670_v48  ;;  %v703_v43 = vsub.f32 -2.0794415, %v701_v7 }
 0x22d   : > { %v704_v44 = vsub.f32 -2.0794415, %v702_v41  ;;  %v705_v20 = vmul.f32 0.1, %v703_v43 }
 0x22f   : > { %v706_v14 = vmul.f32 0.1, %v704_v44  ;;  %v707_v19 = vadd.f32 %v1115_v3, %v705_v20 }
 0x231   : > { %v708_v45 = vadd.f32 %v1111_v61, %v706_v14  ;;  %v711_v17 = vsel %vm523_vm0, %v707_v19, 0.0 }
 0x233   : > { %v712_v47 = vsel %vm523_vm0, %v708_v45, 0.0 }
 0x270   : > { %v632_v42 = vpop.xlane.xlu2 %631 }
 0x271   : > { %v633_v27 = vrot.slane %v632_v42, 4 }
 0x273   : > { %v634_v2 = vadd.f32 %v633_v27, %v632_v42 }
 0x275   : > { %v635_v28 = vrot.slane %v634_v2, 2 }
 0x277   : > { %v636_v63 = vadd.f32 %v635_v28, %v634_v2 }
 0x279   : > { %v637_v1 = vrot.slane %v636_v63, 1 }
 0x27b   : > { %v638_v33 = vadd.f32 %v637_v1, %v636_v63 }
 0x27d   : > { %904 = vpush %v638_v33 }
 0x2ae   : > { %s905_s13 = spop %904 }
 0x2af   : > { %s640_s14 = smul.f32 0.5, %s905_s13 }
 0x2b1   : > { %p1727_p1 = scmp.ge.f32.partialorder %s640_s14, 0.01 }
 0x2b3   : > { %p643_p2 = pnand %p642_p0, %p1727_p1  ;;  %p545_p4 = pnand %p1727_p1, %p543_p3 }
 0x2b4   :  { %s771_s19 = sshll.u32 (%p545_p4), %s1807_s3, 4  ;;  %s1137_s20 = smov (%p545_p4), [#allocation4]   ;;  %746 = vst.msk [vmem:[%s1808_s4] sm:$0xff] (%p545_p4), %vm623_vm1, %v1678_v55  ;;  %s772_s19 = int_to_ptr.hbm [resolvable:$true] %s771_s19 }
 0x2b5   : > { %s871_s16 = scalar_select %p643_p2, 0, 1  ;;  %747 = vst.msk [vmem:[%s1808_s4 + $0x8] sm:$0xff] (%p545_p4), %vm623_vm1, %v1688_v29 }
 0x2b6   :  { %548 = sbr.rel (!%p545_p4) target bundleno = 223 (0xdf), region = 59  ;;  %s769_s21 = sshll.u32 (%p545_p4), %s1137_s20, 4  ;;  %748 = vst.msk [vmem:[%s1808_s4 + $0x10] sm:$0xff] (%p545_p4), %vm623_vm1, %v1681_v58  ;;  %s770_s21 = int_to_ptr.vmem [resolvable:$true] %s769_s21 }
 0x2b7   : > { %v714_v46 = vstv %s871_s16  ;;  %s1138_s25 = smov (%p545_p4), 128   ;;  %s1139_s26 = smov (%p545_p4), 8   ;;  %749 = vst.msk [vmem:[%s1808_s4 + $0x18] sm:$0xff] (%p545_p4), %vm623_vm1, %v1696_v31 }
 0x2b8   : > { %vm715_vm2 = vcmp.eq.s32.totalorder %v714_v46, 1  ;;  %777 = dma.vmem_to_hbm [thread:$0]  (%p545_p4), %s770_s21, 512, %s772_s19, [#allocation5], %s1138_s25, %s1138_s25, %s1139_s26  }
 0x2b9   : > { %v716_v48 = vsel %vm715_vm2, %v711_v17, %v1115_v3   ;;  %v717_v9 = vsel %vm715_vm2, %v712_v47, %v1111_v61   ;;  %s1140_s6 = smov (%p545_p4), [#allocation2]   ;;  %s786_s10 = sshll.u32 (%p545_p4), %s1809_s5, 4  ;;  %s787_s10 = int_to_ptr.hbm [resolvable:$true] %s786_s10 }
 0x2ba   : > { %v1812_v61 = vmov %v717_v9  ;;  %v1813_v3 = vmov %v716_v48  ;;  %v727_v15 = vmul.f32 (%p545_p4), 10.0, %v716_v48  ;;  %v728_v52 = vmul.f32 (%p545_p4), 10.0, %v717_v9  ;;  %750 = vst [vmem:[#allocation6] sm:$0x1] (%p545_p4), %v716_v48  ;;  %s756_s7 = sshll.u32 (%p545_p4), %s1140_s6, 4  ;;  %s1141_s11 = smov (%p545_p4), [#allocation6]   ;;  %s757_s7 = int_to_ptr.vmem [resolvable:$true] %s756_s7 }
 0x2bb   :  { %751 = vst [vmem:[#allocation6 + $0x1] sm:$0x1] %v717_v9  ;;  %s784_s12 = sshll.u32 %s1141_s11, 4  ;;  %s758_s13 = sshll.u32 %s1806_s2, 4  ;;  %s785_s12 = int_to_ptr.vmem [resolvable:$true] %s784_s12  ;;  %s759_s13 = int_to_ptr.hbm [resolvable:$true] %s758_s13 }
 0x2bc   :  { %v729_v53 = vadd.f32 %v727_v15, %v1693_v30  ;;  %v730_v56 = vadd.f32 %v727_v15, %v1708_v37  ;;  %v731_v57 = vadd.f32 %v728_v52, %v1702_v24  ;;  %v732_v49 = vadd.f32 %v728_v52, %v1810_v32  ;;  %s1142_s14 = smov 16   ;;  %s1143_s15 = smov 1  }
 0x2bd   :  { %792 = dma.vmem_to_hbm [thread:$0]  %s785_s12, 32, %s787_s10, [#allocation5], %s1142_s14, %s1142_s14, %s1143_s15  }
 0x2be   :  { %v733_v50 = vmul.f32 1.442695, %v729_v53  ;;  %v735_v8 = vmul.f32 1.442695, %v730_v56  ;;  %v737_v54 = vmul.f32 1.442695, %v731_v57 }
 0x2bf   :  { %v739_v59 = vmul.f32 1.442695, %v732_v49 }
 0x2c0   :  { %997 = vpow2.f32 %v733_v50 }
 0x2c1   :  { %999 = vpow2.f32 %v735_v8 }
 0x2c2   :  { %1001 = vpow2.f32 %v737_v54 }
 0x2c3   :  { %1003 = vpow2.f32 %v739_v59 }
 0x2c6   :  { %v998_v60 = vpop.eup %997 }
 0x2c7   :  { %v1000_v61 = vpop.eup %999  ;;  %741 = vst [vmem:[#allocation2] sm:$0xff] %v998_v60 }
 0x2c8   :  { %v1002_v3 = vpop.eup %1001  ;;  %742 = vst [vmem:[#allocation2 + $0x8] sm:$0xff] %v1000_v61 }
 0x2c9   :  { %v1004_v55 = vpop.eup %1003  ;;  %743 = vst [vmem:[#allocation2 + $0x10] sm:$0xff] %v1002_v3 }
 0x2ca   :  { %744 = vst [vmem:[#allocation2 + $0x18] sm:$0xff] %v1004_v55 }
 0x2cb   :  { %764 = dma.vmem_to_hbm [thread:$0]  %s757_s7, 512, %s759_s13, [#allocation3], %s1138_s25, %s1138_s25, %s1139_s26  }
 0x2cc   :  { %1105 = dma.done.wait [#allocation3], 512  }
 0x2cd   :  { %1106 = vsyncadd [#allocation3], 4294966784 }
 0x2ce   :  { %1107 = dma.done.wait [#allocation5], 544  }
 0x2cf   :  { %1108 = vsyncadd [#allocation5], 4294966752 }
 0x2d0   :  { %807 = vsyncpa [#allocation3], 1 }
 0x2d1   :  { %808 = vsyncpa [#allocation5], 1 }

</bundles_post_ra>
